<compile_context>
chip_gen: v7x
topology: tpu7x:2x2x1
jax: 0.10.0
libtpu: 0.0.40
codegen_flags: <defaults>
</compile_context>

<pallas_src>
import functools
import math

import jax
import jax.numpy as jnp
from jax.experimental import pallas as pl
from jax.experimental.pallas import tpu as pltpu


def _binned_one_hot_kernel(bins_ref, x_ref, expand_ref, pat_ref, out_ref,
                           *, mm_precision):
    # bins_ref  : SMEM (K,) f32          — bin boundaries
    # x_ref     : VMEM (tm, Lg)          — input tile
    # expand_ref: VMEM (Lg, Lg*nb) f32   — 0/1 lane-expand matrix, e[c, l] = (l // nb == c)
    # pat_ref   : VMEM (1, Lg*nb) f32    — lane pattern l % nb
    # out_ref   : VMEM (tm, Lg*nb)       — lane-dense one-hot output tile
    x = x_ref[...].astype(jnp.float32)                        # (tm, Lg)
    num_boundaries = bins_ref.shape[0]
    nb = out_ref.shape[-1] // x_ref.shape[-1]                 # num_bins = K - 1

    # torch.bucketize(right=False) == count of boundaries strictly less than x.
    # K is small & static; this runs on the dense input tile (nb x smaller than
    # the output tile), so it is cheap VALU filler under the store bottleneck.
    cnt = jnp.zeros(x.shape, jnp.int32)
    for k in range(num_boundaries):
        cnt = cnt + (x > bins_ref[k]).astype(jnp.int32)
    idx = jnp.clip(cnt - 1, 0, nb - 1).astype(jnp.float32)    # (tm, Lg)

    # Lane-interleaved repeat of idx by nb, done on the MXU (free slot here):
    # idx_rep[r, c*nb + b] == idx[r, c]; exact for small integer idx values.
    idx_rep = jnp.dot(idx, expand_ref[...],
                      preferred_element_type=jnp.float32,
                      precision=mm_precision)                 # (tm, Lg*nb)
    out_ref[...] = (idx_rep == pat_ref[...]).astype(out_ref.dtype)


def _pick_col_group(cols: int, num_bins: int) -> int:
    """Column-group width Lg (must divide cols; output lane width = Lg*num_bins)."""
    if cols <= 512:
        return cols
    for lg in (512, 256, 128):
        if cols % lg == 0:
            return lg
    # TODO(synk): ragged column grouping for very large cols not divisible by 128.
    return cols


def binned_one_hot(data: jax.Array, v_bins: jax.Array, *,
                   out_dtype=None,
                   vmem_tile_bytes: int = 4 * 1024 * 1024) -> jax.Array:
    """Pallas equivalent of BinnedOneHotEmbedding.forward."""
    out_dtype = data.dtype if out_dtype is None else jnp.dtype(out_dtype)
    orig_shape = data.shape
    cols = orig_shape[-1] if data.ndim >= 1 else 1
    rows = math.prod(orig_shape[:-1]) if data.ndim >= 2 else 1
    num_bins = int(v_bins.shape[0]) - 1

    lg = _pick_col_group(cols, num_bins)
    lanes = lg * num_bins
    n_col_groups = cols // lg

    # Row-tile size from a VMEM budget (output tile dominates); multiple of 8,
    # or the full row extent when the whole problem fits in one block.
    per_row_bytes = lanes * jnp.dtype(out_dtype).itemsize + lg * data.dtype.itemsize
    tm = max(8, (vmem_tile_bytes // per_row_bytes) // 8 * 8)
    if rows <= tm:
        tm = rows                                   # full-extent (always legal) block
    n_row_tiles = pl.cdiv(rows, tm)

    data2d = data.reshape(rows, cols)               # row-major: free

    # Constant helper operands; constant index_map -> DMA'd into VMEM only once.
    lane = jnp.arange(lanes, dtype=jnp.int32)
    expand = (lane[None, :] // num_bins
              == jnp.arange(lg, dtype=jnp.int32)[:, None]).astype(jnp.float32)
    pat = (lane % num_bins).astype(jnp.float32)[None, :]

    # Bin indices stay exact through bf16 MXU passes only up to 256 bins.
    mm_precision = jax.lax.Precision.HIGHEST if num_bins > 256 else None

    total = rows * cols
    cost = pl.CostEstimate(
        flops=total * (num_bins + 2) + 2 * total * num_bins * lg,
        transcendentals=0,
        bytes_accessed=(total * data.dtype.itemsize
                        + total * num_bins * jnp.dtype(out_dtype).itemsize
                        + int(expand.size) * 4 + int(pat.size) * 4
                        + int(v_bins.shape[0]) * 4),
    )

    out2d = pl.pallas_call(
        functools.partial(_binned_one_hot_kernel, mm_precision=mm_precision),
        out_shape=jax.ShapeDtypeStruct((rows, cols * num_bins), out_dtype),
        grid=(n_row_tiles, n_col_groups),
        in_specs=[
            pl.BlockSpec(memory_space=pltpu.SMEM),                 # v_bins (whole)
            pl.BlockSpec((tm, lg), lambda i, j: (i, j)),           # data tile
            pl.BlockSpec((lg, lanes), lambda i, j: (0, 0)),        # expand matrix
            pl.BlockSpec((1, lanes), lambda i, j: (0, 0)),         # lane pattern
        ],
        out_specs=pl.BlockSpec((tm, lanes), lambda i, j: (i, j)),
        compiler_params=pltpu.CompilerParams(
            dimension_semantics=("parallel", "parallel"),
            vmem_limit_bytes=32 * 1024 * 1024,
        ),
        cost_estimate=cost,
    )(v_bins.astype(jnp.float32), data2d, expand, pat)

    # (rows, cols*nb) row-major == (*orig_shape, nb) row-major: free reshape.
    return out2d.reshape(*orig_shape, num_bins)


def _reference(data, v_bins):
    # pure-JAX reference for sanity checking
    cnt = jnp.sum(data[..., None] > v_bins, axis=-1)
    idx = jnp.clip(cnt - 1, 0, v_bins.shape[0] - 2)
    return jax.nn.one_hot(idx, v_bins.shape[0] - 1, dtype=data.dtype)


if __name__ == "__main__":
    key = jax.random.PRNGKey(0)
    # small shapes: batch=2, seq=16, feature=16; 9 boundaries -> 8 bins
    data = jax.random.uniform(key, (2, 16, 16), dtype=jnp.float32) * 10.0 - 1.0
    v_bins = jnp.linspace(0.0, 8.0, 9, dtype=jnp.float32)

    out = jax.block_until_ready(binned_one_hot(data, v_bins))
    ref = _reference(data, v_bins)
    assert out.shape == (2, 16, 16, 8), out.shape
    assert out.dtype == data.dtype
    assert jnp.array_equal(out, ref), "mismatch vs reference"

    # docstring example
    ex_x = jnp.array([[0.5, 1.5, 2.5], [3.5, 4.5, 5.5]], dtype=jnp.float32)
    ex_bins = jnp.array([1.0, 2.0, 3.0, 4.0, 5.0], dtype=jnp.float32)
    ex_out = jax.block_until_ready(binned_one_hot(ex_x, ex_bins))
    ex_expect = jnp.array(
        [[[1., 0., 0., 0.], [1., 0., 0., 0.], [0., 1., 0., 0.]],
         [[0., 0., 1., 0.], [0., 0., 0., 1.], [0., 0., 0., 1.]]],
        dtype=jnp.float32)
    assert jnp.array_equal(ex_out, ex_expect), "docstring example mismatch"

    # ragged-row path: force a small row tile so rows % tm != 0 (no pad / no slice)
    key2 = jax.random.PRNGKey(1)
    big = jax.random.uniform(key2, (3, 50, 16), dtype=jnp.float32) * 12.0 - 2.0
    out_big = jax.block_until_ready(
        binned_one_hot(big, v_bins, vmem_tile_bytes=16 * 1024))
    assert jnp.array_equal(out_big, _reference(big, v_bins)), "ragged-row mismatch"

    print("KERNEL_OK")
</pallas_src>

<mosaic_0001>
module attributes {stable_mosaic.version = 11 : i64} {
  func.func @_binned_one_hot_kernel(%arg0: i32, %arg1: i32, %arg2: memref<9xf32, #tpu.memory_space<smem>>, %arg3: memref<32x16xf32, #tpu.memory_space<vmem>>, %arg4: memref<16x128xf32, #tpu.memory_space<vmem>>, %arg5: memref<1x128xf32, #tpu.memory_space<vmem>>, %arg6: memref<32x128xf32, #tpu.memory_space<vmem>>) attributes {dimension_semantics = [#tpu.dimension_semantics<parallel>, #tpu.dimension_semantics<parallel>], iteration_bounds = array<i64: 1, 1>, scalar_prefetch = 0 : i64, scratch_operands = 0 : i64, tpu.core_type = #tpu.core_type<tc>, window_params = [{transform_indices = @transform_0, window_bounds = array<i64: 9>}, {transform_indices = @transform_1, window_bounds = array<i64: 32, 16>}, {pipeline_mode = #tpu.pipeline_mode<synchronous>, transform_indices = @transform_2, window_bounds = array<i64: 16, 128>}, {pipeline_mode = #tpu.pipeline_mode<synchronous>, transform_indices = @transform_3, window_bounds = array<i64: 1, 128>}, {transform_indices = @transform_4, window_bounds = array<i64: 32, 128>}]} {
    %c0 = arith.constant 0 : index
    %c0_0 = arith.constant 0 : index
    %0 = vector.load %arg3[%c0, %c0_0] : memref<32x16xf32, #tpu.memory_space<vmem>>, vector<32x16xf32>
    %c0_i32 = arith.constant 0 : i32
    %1 = vector.broadcast %c0_i32 : i32 to vector<32x16xi32>
    %c0_1 = arith.constant 0 : index
    %2 = memref.load %arg2[%c0_1] : memref<9xf32, #tpu.memory_space<smem>>
    %3 = vector.broadcast %2 : f32 to vector<32x16xf32>
    %4 = arith.cmpf ogt, %0, %3 : vector<32x16xf32>
    %5 = arith.extui %4 : vector<32x16xi1> to vector<32x16xi32>
    %6 = arith.addi %1, %5 : vector<32x16xi32>
    %c1 = arith.constant 1 : index
    %7 = memref.load %arg2[%c1] : memref<9xf32, #tpu.memory_space<smem>>
    %8 = vector.broadcast %7 : f32 to vector<32x16xf32>
    %9 = arith.cmpf ogt, %0, %8 : vector<32x16xf32>
    %10 = arith.extui %9 : vector<32x16xi1> to vector<32x16xi32>
    %11 = arith.addi %6, %10 : vector<32x16xi32>
    %c2 = arith.constant 2 : index
    %12 = memref.load %arg2[%c2] : memref<9xf32, #tpu.memory_space<smem>>
    %13 = vector.broadcast %12 : f32 to vector<32x16xf32>
    %14 = arith.cmpf ogt, %0, %13 : vector<32x16xf32>
    %15 = arith.extui %14 : vector<32x16xi1> to vector<32x16xi32>
    %16 = arith.addi %11, %15 : vector<32x16xi32>
    %c3 = arith.constant 3 : index
    %17 = memref.load %arg2[%c3] : memref<9xf32, #tpu.memory_space<smem>>
    %18 = vector.broadcast %17 : f32 to vector<32x16xf32>
    %19 = arith.cmpf ogt, %0, %18 : vector<32x16xf32>
    %20 = arith.extui %19 : vector<32x16xi1> to vector<32x16xi32>
    %21 = arith.addi %16, %20 : vector<32x16xi32>
    %c4 = arith.constant 4 : index
    %22 = memref.load %arg2[%c4] : memref<9xf32, #tpu.memory_space<smem>>
    %23 = vector.broadcast %22 : f32 to vector<32x16xf32>
    %24 = arith.cmpf ogt, %0, %23 : vector<32x16xf32>
    %25 = arith.extui %24 : vector<32x16xi1> to vector<32x16xi32>
    %26 = arith.addi %21, %25 : vector<32x16xi32>
    %c5 = arith.constant 5 : index
    %27 = memref.load %arg2[%c5] : memref<9xf32, #tpu.memory_space<smem>>
    %28 = vector.broadcast %27 : f32 to vector<32x16xf32>
    %29 = arith.cmpf ogt, %0, %28 : vector<32x16xf32>
    %30 = arith.extui %29 : vector<32x16xi1> to vector<32x16xi32>
    %31 = arith.addi %26, %30 : vector<32x16xi32>
    %c6 = arith.constant 6 : index
    %32 = memref.load %arg2[%c6] : memref<9xf32, #tpu.memory_space<smem>>
    %33 = vector.broadcast %32 : f32 to vector<32x16xf32>
    %34 = arith.cmpf ogt, %0, %33 : vector<32x16xf32>
    %35 = arith.extui %34 : vector<32x16xi1> to vector<32x16xi32>
    %36 = arith.addi %31, %35 : vector<32x16xi32>
    %c7 = arith.constant 7 : index
    %37 = memref.load %arg2[%c7] : memref<9xf32, #tpu.memory_space<smem>>
    %38 = vector.broadcast %37 : f32 to vector<32x16xf32>
    %39 = arith.cmpf ogt, %0, %38 : vector<32x16xf32>
    %40 = arith.extui %39 : vector<32x16xi1> to vector<32x16xi32>
    %41 = arith.addi %36, %40 : vector<32x16xi32>
    %c8 = arith.constant 8 : index
    %42 = memref.load %arg2[%c8] : memref<9xf32, #tpu.memory_space<smem>>
    %43 = vector.broadcast %42 : f32 to vector<32x16xf32>
    %44 = arith.cmpf ogt, %0, %43 : vector<32x16xf32>
    %45 = arith.extui %44 : vector<32x16xi1> to vector<32x16xi32>
    %46 = arith.addi %41, %45 : vector<32x16xi32>
    %c1_i32 = arith.constant 1 : i32
    %47 = vector.broadcast %c1_i32 : i32 to vector<32x16xi32>
    %48 = arith.subi %46, %47 : vector<32x16xi32>
    %c0_i32_2 = arith.constant 0 : i32
    %c7_i32 = arith.constant 7 : i32
    %49 = vector.broadcast %c0_i32_2 : i32 to vector<32x16xi32>
    %50 = arith.maxsi %49, %48 : vector<32x16xi32>
    %51 = vector.broadcast %c7_i32 : i32 to vector<32x16xi32>
    %52 = arith.minsi %51, %50 : vector<32x16xi32>
    %53 = arith.sitofp %52 : vector<32x16xi32> to vector<32x16xf32>
    %c0_3 = arith.constant 0 : index
    %c0_4 = arith.constant 0 : index
    %54 = vector.load %arg4[%c0_3, %c0_4] : memref<16x128xf32, #tpu.memory_space<vmem>>, vector<16x128xf32>
    %cst = arith.constant dense<0.000000e+00> : vector<32x128xf32>
    %55 = tpu.matmul %53, %54, %cst {dimension_numbers = #tpu.dot_dimension_numbers<[1], [0], [0], [1], [0, 0, 1, 1], [], []>} : vector<32x16xf32>, vector<16x128xf32>, vector<32x128xf32> -> vector<32x128xf32>
    %c0_5 = arith.constant 0 : index
    %c0_6 = arith.constant 0 : index
    %56 = vector.load %arg5[%c0_5, %c0_6] : memref<1x128xf32, #tpu.memory_space<vmem>>, vector<1x128xf32>
    %57 = vector.broadcast %56 : vector<1x128xf32> to vector<32x128xf32>
    %58 = arith.cmpf oeq, %55, %57 : vector<32x128xf32>
    %59 = arith.extui %58 : vector<32x128xi1> to vector<32x128xi32>
    %60 = arith.sitofp %59 : vector<32x128xi32> to vector<32x128xf32>
    %c0_7 = arith.constant 0 : index
    %c0_8 = arith.constant 0 : index
    %61 = vector.load %arg6[%c0_7, %c0_8] : memref<32x128xf32, #tpu.memory_space<vmem>>, vector<32x128xf32>
    tpu.vector_store %arg6[%c0_7, %c0_8], %60 {strides = array<i32>} : memref<32x128xf32, #tpu.memory_space<vmem>>, vector<32x128xf32>,
    return
  }
  func.func @transform_0(%arg0: i32, %arg1: i32) -> i32 {
    %c0_i32 = arith.constant 0 : i32
    %c0_i32_0 = arith.constant 0 : i32
    return %c0_i32 : i32
  }
  func.func @transform_1(%arg0: i32, %arg1: i32) -> (i32, i32) {
    %c0_i32 = arith.constant 0 : i32
    return %arg0, %arg1 : i32, i32
  }
  func.func @transform_2(%arg0: i32, %arg1: i32) -> (i32, i32) {
    %c0_i32 = arith.constant 0 : i32
    %c0_i32_0 = arith.constant 0 : i32
    %c0_i32_1 = arith.constant 0 : i32
    return %c0_i32, %c0_i32_0 : i32, i32
  }
  func.func @transform_3(%arg0: i32, %arg1: i32) -> (i32, i32) {
    %c0_i32 = arith.constant 0 : i32
    %c0_i32_0 = arith.constant 0 : i32
    %c0_i32_1 = arith.constant 0 : i32
    return %c0_i32, %c0_i32_0 : i32, i32
  }
  func.func @transform_4(%arg0: i32, %arg1: i32) -> (i32, i32) {
    %c0_i32 = arith.constant 0 : i32
    return %arg0, %arg1 : i32, i32
  }
}

</mosaic_0001>

<bundles_post_ra>
// kernel: tpu_custom_call.1
= control target key start
LH: loop header
LB: loop body
LE: loop exit
PB: predicated region body
PF: predicated region fallthrough
CT: control target
= control target key end

     0   :  { %9 = vsyncpa [#allocation4], 0  ;;  %s605_s0 = inlined_call_operand.vmem [shape: f32[9], index: 0, kind: input, shape index: {}]   ;;  %s606_s1 = inlined_call_operand.vmem [shape: f32[32,16], index: 1, kind: input, shape index: {}]   ;;  %s607_s2 = inlined_call_operand.vmem [shape: f32[16,128], index: 2, kind: input, shape index: {}]   ;;  %s608_s3 = inlined_call_operand.vmem [shape: f32[1,128], index: 3, kind: input, shape index: {}]   ;;  %s609_s4 = inlined_call_operand.hbm [shape: f32[32,128], index: 4, kind: output, shape index: {}]  }
   0x1   :  { %10 = vsyncpa [#allocation3], 0  ;;  %s17_s17 = sshll.u32 %s605_s0, 4  ;;  %s18_s17 = int_to_ptr.vmem [resolvable:$true] %s17_s17 }
   0x2   :  { %s370_s18 = scalar_lea.vmem %s18_s17, 16  ;;  %p375_p1 = scmp.lt.s32.totalorder %s18_s17, %s18_s17 }
   0x3   :  { %p371_p0 = scmp.ne.s32.totalorder %s18_s17, %s370_s18  ;;  %p376_p2 = scmp.lt.s32.totalorder %s370_s18, %s370_s18 }
   0x5   :  { %p377_p3 = por %p376_p2, %p375_p1 }
   0x7   :  { %p378_p4 = pnand %p377_p3, %p371_p0 }
   0x9   :  { %381 = shalt.err (!%p378_p4)
}
   0xa   :  { %s408_s19 = smov [#allocation2]  }
   0xb   :  { %20 = dma.vmem_to_smem %s18_s17, 16, %s408_s19, [#allocation4]  }
   0xc   :  { %404 = dma.done.wait [#allocation4], 16  }
   0xd   :  { %405 = vsyncadd [#allocation4], 4294967280 }
   0xe   :  { %30 = sfence }
   0xf   :  { %v181_v0 = vld [vmem:[%s607_s2] sm:$0xff]  ;;  %v182_v1 = vld [vmem:[%s607_s2 + $0x8] sm:$0xff]  ;;  %s35_s0 = sld [smem:[#allocation2]]  ;;  %s321_s24 = sld [smem:[#allocation2 + $0x1]]  ;;  %v461_v7 = vld [vmem:[%s606_s1 + $0x10] sm:$0xff]  ;;  %v409_v8 = vmov 0  }
  0x10   :  { %v358_v2 = vpack.c.bf16 %v182_v1, %v181_v0  ;;  %s322_s25 = sld [smem:[#allocation2 + $0x2]]  ;;  %s323_s26 = sld [smem:[#allocation2 + $0x3]]  ;;  %v31_v3 = vld [vmem:[%s606_s1] sm:$0xff]  ;;  %v508_v32 = vld [vmem:[%s606_s1 + $0x8] sm:$0xff]  ;;  %v539_v48 = vld [vmem:[%s606_s1 + $0x18] sm:$0xff] }
  0x11   :  { %s324_s27 = sld [smem:[#allocation2 + $0x4]]  ;;  %s325_s28 = sld [smem:[#allocation2 + $0x5]] }
  0x12   :  { %359 = vmatprep.subr.bf16.mxu0 %v358_v2  ;;  %362 = vmatprep.subr.bf16.mxu1 %v358_v2  ;;  %s326_s29 = sld [smem:[#allocation2 + $0x6]]  ;;  %s327_s6 = sld [smem:[#allocation2 + $0x7]] }
  0x13   :  { %361 = vmatpush3.bf16.msra.mxu0 %v358_v2  ;;  %363 = vmatpush3.bf16.msra.mxu1 %v358_v2  ;;  %s328_s7 = sld [smem:[#allocation2 + $0x8]]  ;;  %s411_s14 = smov [#allocation5]  }
  0x14   :  { %s309_s15 = sshll.u32 %s411_s14, 4  ;;  %s310_s15 = int_to_ptr.vmem [resolvable:$true] %s309_s15 }
  0x15   :  { %v451_v4 = vstv %s35_s0  ;;  %v454_v5 = vstv %s321_s24  ;;  %p387_p6 = scmp.lt.s32.totalorder %s310_s15, %s310_s15 }
  0x16   :  { %vm37_vm0 = vcmp.gt.f32.partialorder %v31_v3, %v451_v4  ;;  %v456_v6 = vstv %s322_s25  ;;  %vm47_vm1 = vcmp.gt.f32.partialorder %v31_v3, %v454_v5  ;;  %v466_v10 = vstv %s323_s26 }
  0x17   :  { %v41_v9 = vsel %vm37_vm0, 1, %v409_v8  ;;  %vm61_vm2 = vcmp.gt.f32.partialorder %v31_v3, %v456_v6  ;;  %v51_v11 = vsel %vm47_vm1, 1, %v409_v8  ;;  %vm75_vm3 = vcmp.gt.f32.partialorder %v31_v3, %v466_v10 }
  0x18   :  { %v65_v12 = vsel %vm61_vm2, 1, %v409_v8  ;;  %v471_v13 = vstv %s324_s27  ;;  %v55_v14 = vadd.s32 %v51_v11, %v41_v9  ;;  %v474_v15 = vstv %s325_s28 }
  0x19   :  { %vm89_vm4 = vcmp.gt.f32.partialorder %v31_v3, %v471_v13  ;;  %vm39_vm5 = vcmp.gt.f32.partialorder %v461_v7, %v451_v4  ;;  %v79_v16 = vsel %vm75_vm3, 1, %v409_v8  ;;  %vm103_vm6 = vcmp.gt.f32.partialorder %v31_v3, %v474_v15 }
  0x1a   :  { %v480_v17 = vstv %s326_s29  ;;  %v482_v18 = vstv %s327_s6  ;;  %v69_v19 = vadd.s32 %v65_v12, %v55_v14  ;;  %v93_v20 = vsel %vm89_vm4, 1, %v409_v8 }
  0x1b   :  { %vm117_vm7 = vcmp.gt.f32.partialorder %v31_v3, %v480_v17  ;;  %vm131_vm8 = vcmp.gt.f32.partialorder %v31_v3, %v482_v18  ;;  %v107_v21 = vsel %vm103_vm6, 1, %v409_v8  ;;  %v489_v23 = vstv %s328_s7 }
  0x1c   :  { %v121_v22 = vsel %vm117_vm7, 1, %v409_v8  ;;  %v43_v24 = vsel %vm39_vm5, 1, %v409_v8  ;;  %v83_v25 = vadd.s32 %v79_v16, %v69_v19  ;;  %vm145_vm9 = vcmp.gt.f32.partialorder %v31_v3, %v489_v23 }
  0x1d   :  { %vm49_vm10 = vcmp.gt.f32.partialorder %v461_v7, %v454_v5  ;;  %vm63_vm11 = vcmp.gt.f32.partialorder %v461_v7, %v456_v6  ;;  %v135_v26 = vsel %vm131_vm8, 1, %v409_v8  ;;  %vm77_vm12 = vcmp.gt.f32.partialorder %v461_v7, %v466_v10 }
  0x1e   :  { %v53_v27 = vsel %vm49_vm10, 1, %v409_v8  ;;  %v67_v28 = vsel %vm63_vm11, 1, %v409_v8  ;;  %v97_v29 = vadd.s32 %v93_v20, %v83_v25  ;;  %v149_v30 = vsel %vm145_vm9, 1, %v409_v8 }
  0x1f   :  { %v57_v31 = vadd.s32 %v53_v27, %v43_v24  ;;  %vm91_vm13 = vcmp.gt.f32.partialorder %v461_v7, %v471_v13  ;;  %v81_v33 = vsel %vm77_vm12, 1, %v409_v8  ;;  %vm105_vm14 = vcmp.gt.f32.partialorder %v461_v7, %v474_v15 }
  0x20   :  { %vm119_vm15 = vcmp.gt.f32.partialorder %v461_v7, %v480_v17  ;;  %vm133_vm0 = vcmp.gt.f32.partialorder %v461_v7, %v482_v18  ;;  %v111_v34 = vadd.s32 %v107_v21, %v97_v29  ;;  %v95_v36 = vsel %vm91_vm13, 1, %v409_v8 }
  0x21   :  { %v71_v35 = vadd.s32 %v67_v28, %v57_v31  ;;  %v109_v37 = vsel %vm105_vm14, 1, %v409_v8  ;;  %v123_v38 = vsel %vm119_vm15, 1, %v409_v8  ;;  %v137_v39 = vsel %vm133_vm0, 1, %v409_v8 }
  0x22   :  { %vm38_vm1 = vcmp.gt.f32.partialorder %v508_v32, %v451_v4  ;;  %vm48_vm2 = vcmp.gt.f32.partialorder %v508_v32, %v454_v5  ;;  %v125_v40 = vadd.s32 %v121_v22, %v111_v34  ;;  %vm147_vm3 = vcmp.gt.f32.partialorder %v461_v7, %v489_v23 }
  0x23   :  { %v85_v41 = vadd.s32 %v81_v33, %v71_v35  ;;  %v42_v42 = vsel %vm38_vm1, 1, %v409_v8  ;;  %v52_v43 = vsel %vm48_vm2, 1, %v409_v8  ;;  %vm62_vm4 = vcmp.gt.f32.partialorder %v508_v32, %v456_v6 }
  0x24   :  { %vm76_vm5 = vcmp.gt.f32.partialorder %v508_v32, %v466_v10  ;;  %vm90_vm6 = vcmp.gt.f32.partialorder %v508_v32, %v471_v13  ;;  %v139_v44 = vadd.s32 %v135_v26, %v125_v40  ;;  %v56_v46 = vadd.s32 %v52_v43, %v42_v42 }
  0x25   :  { %v99_v45 = vadd.s32 %v95_v36, %v85_v41  ;;  %v66_v47 = vsel %vm62_vm4, 1, %v409_v8  ;;  %vm183_vm7 = vcmask 130048   ;;  %v151_v49 = vsel %vm147_vm3, 1, %v409_v8 }
  0x26   :  { %v80_v50 = vsel %vm76_vm5, 1, %v409_v8  ;;  %vm104_vm8 = vcmp.gt.f32.partialorder %v508_v32, %v474_v15  ;;  %vm118_vm9 = vcmp.gt.f32.partialorder %v508_v32, %v480_v17  ;;  %v153_v51 = vadd.s32 %v149_v30, %v139_v44 }
  0x27   :  { %v113_v52 = vadd.s32 %v109_v37, %v99_v45  ;;  %v70_v53 = vadd.s32 %v66_v47, %v56_v46  ;;  %v94_v54 = vsel %vm90_vm6, 1, %v409_v8  ;;  %v108_v55 = vsel %vm104_vm8, 1, %v409_v8 }
  0x28   :  { %v122_v56 = vsel %vm118_vm9, 1, %v409_v8  ;;  %vm132_vm10 = vcmp.gt.f32.partialorder %v508_v32, %v482_v18  ;;  %vm40_vm11 = vcmp.gt.f32.partialorder %v539_v48, %v451_v4  ;;  %v329_v57 = vadd.s32 4294967295, %v153_v51 }
  0x29   :  { %v127_v58 = vadd.s32 %v123_v38, %v113_v52  ;;  %v84_v59 = vadd.s32 %v80_v50, %v70_v53  ;;  %vm146_vm12 = vcmp.gt.f32.partialorder %v508_v32, %v489_v23  ;;  %v136_v60 = vsel %vm132_vm10, 1, %v409_v8 }
  0x2a   :  { %v44_v61 = vsel %vm40_vm11, 1, %v409_v8  ;;  %vm50_vm13 = vcmp.gt.f32.partialorder %v539_v48, %v454_v5  ;;  %vm64_vm14 = vcmp.gt.f32.partialorder %v539_v48, %v456_v6  ;;  %vm161_vm15 = vcmp.gt.s32.totalorder %v329_v57, 0 }
  0x2b   :  { %v141_v62 = vadd.s32 %v137_v39, %v127_v58  ;;  %v98_v63 = vadd.s32 %v94_v54, %v84_v59  ;;  %v54_v0 = vsel %vm50_vm13, 1, %v409_v8  ;;  %v162_v1 = vsel %vm161_vm15, %v329_v57, 0 }
  0x2c   :  { %v58_v2 = vadd.s32 %v54_v0, %v44_v61  ;;  %v68_v3 = vsel %vm64_vm14, 1, %v409_v8  ;;  %vm78_vm0 = vcmp.gt.f32.partialorder %v539_v48, %v466_v10  ;;  %vm169_vm1 = vcmp.lt.s32.totalorder %v162_v1, 7 }
  0x2d   :  { %v155_v4 = vadd.s32 %v151_v49, %v141_v62  ;;  %v112_v7 = vadd.s32 %v108_v55, %v98_v63  ;;  %v82_v5 = vsel %vm78_vm0, 1, %v409_v8  ;;  %v170_v9 = vsel %vm169_vm1, %v162_v1, 7 }
  0x2e   :  { %v72_v11 = vadd.s32 %v68_v3, %v58_v2  ;;  %vm92_vm2 = vcmp.gt.f32.partialorder %v539_v48, %v471_v13  ;;  %vm106_vm3 = vcmp.gt.f32.partialorder %v539_v48, %v474_v15  ;;  %v177_v6 = vcvt.s32.f32 %v170_v9 }
  0x2f   :  { %v331_v12 = vadd.s32 4294967295, %v155_v4  ;;  %v126_v14 = vadd.s32 %v122_v56, %v112_v7  ;;  %v96_v16 = vsel %vm92_vm2, 1, %v409_v8  ;;  %v150_v10 = vsel %vm146_vm12, 1, %v409_v8 }
  0x30   :  { %v86_v19 = vadd.s32 %v82_v5, %v72_v11  ;;  %vm120_vm4 = vcmp.gt.f32.partialorder %v539_v48, %v480_v17  ;;  %352 = vmatprep.mubr.msk.f32.mxu0 %vm183_vm7, %v177_v6  ;;  %v110_v15 = vsel %vm106_vm3, 1, %v409_v8  ;;  %vm134_vm6 = vcmp.gt.f32.partialorder %v539_v48, %v482_v18 }
  0x31   :  { %vm165_vm5 = vcmp.gt.s32.totalorder %v331_v12, 0  ;;  %v140_v13 = vadd.s32 %v136_v60, %v126_v14  ;;  %v124_v24 = vsel %vm120_vm4, 1, %v409_v8  ;;  %vm148_vm9 = vcmp.gt.f32.partialorder %v539_v48, %v489_v23 }
  0x32   :  { %v166_v20 = vsel %vm165_vm5, %v331_v12, 0  ;;  %v100_v21 = vadd.s32 %v96_v16, %v86_v19  ;;  %v138_v28 = vsel %vm134_vm6, 1, %v409_v8  ;;  %v152_v30 = vsel %vm148_vm9, 1, %v409_v8  ;;  %v337_v8 = vld [vmem:[%s608_s3] ss:$0 sm:$0xff]  ;;  %s382_s3 = scalar_lea.vmem %s310_s15, 512 }
  0x33   :  { %vm173_vm8 = vcmp.lt.s32.totalorder %v166_v20, 7  ;;  %v154_v22 = vadd.s32 %v150_v10, %v140_v13  ;;  %v410_v40 = vmov 0.0   ;;  %p383_p5 = scmp.ne.s32.totalorder %s310_s15, %s382_s3  ;;  %p388_p7 = scmp.lt.s32.totalorder %s382_s3, %s382_s3 }
  0x34   :  { %v174_v25 = vsel %vm173_vm8, %v166_v20, 7  ;;  %v114_v26 = vadd.s32 %v110_v15, %v100_v21 }
  0x35   :  { %v179_v17 = vcvt.s32.f32 %v174_v25  ;;  %v330_v27 = vadd.s32 4294967295, %v154_v22  ;;  %p389_p8 = por %p388_p7, %p387_p6 }
  0x36   :  { %v128_v29 = vadd.s32 %v124_v24, %v114_v26 }
  0x37   :  { %355 = vmatprep.mubr.msk.f32.mxu1 %vm183_vm7, %v179_v17  ;;  %vm163_vm10 = vcmp.gt.s32.totalorder %v330_v27, 0  ;;  %p390_p9 = pnand %p389_p8, %p383_p5 }
  0x38   :  { %v164_v18 = vsel %vm163_vm10, %v330_v27, 0  ;;  %v142_v31 = vadd.s32 %v138_v28, %v128_v29 }
  0x39   :  { %vm171_vm11 = vcmp.lt.s32.totalorder %v164_v18, 7 }
  0x3a   :  { %v172_v32 = vsel %vm171_vm11, %v164_v18, 7  ;;  %v156_v33 = vadd.s32 %v152_v30, %v142_v31 }
  0x3b   :  { %v178_v34 = vcvt.s32.f32 %v172_v32 }
  0x3c   :  { %v332_v35 = vadd.s32 4294967295, %v156_v33 }
  0x3d   :  { %353 = vmatmul.mubr.msk.f32.vlgmr.msra.gmra.mrb[0].mxu0 %vm183_vm7, %v178_v34 }
  0x3e   :  { %vm167_vm12 = vcmp.gt.s32.totalorder %v332_v35, 0 }
  0x3f   :  { %v168_v23 = vsel %vm167_vm12, %v332_v35, 0 }
  0x40   :  { %vm175_vm13 = vcmp.lt.s32.totalorder %v168_v23, 7 }
  0x41   :  { %v176_v36 = vsel %vm175_vm13, %v168_v23, 7 }
  0x42   :  { %v180_v37 = vcvt.s32.f32 %v176_v36 }
  0x44   :  { %356 = vmatmul.mubr.msk.f32.vlgmr.msra.gmra.mrb[0].mxu1 %vm183_vm7, %v180_v37 }
 0x110   :  { %v354_v38 = vpop.f32.mrb[0].mxu0 }
 0x111   :  { %vm289_vm14 = vcmp.eq.f32.partialorder %v354_v38, %v337_v8  ;;  %v262_v39 = vpop.f32.mrb[1].mxu0 }
 0x112   :  { %v339_v41 = vsel %vm289_vm14, 1.0, %v410_v40  ;;  %vm288_vm15 = vcmp.eq.f32.partialorder %v262_v39, %v337_v8 }
 0x113   :  { %301 = vst [vmem:[#allocation5 + $0x8] sm:$0xff] %v339_v41  ;;  %v338_v42 = vsel %vm288_vm15, 1.0, %v410_v40 }
 0x114   :  { %300 = vst [vmem:[#allocation5] sm:$0xff] %v338_v42 }
 0x117   :  { %v357_v43 = vpop.f32.mrb[0].mxu1 }
 0x118   :  { %vm291_vm0 = vcmp.eq.f32.partialorder %v357_v43, %v337_v8  ;;  %v272_v44 = vpop.f32.mrb[1].mxu1 }
 0x119   :  { %v341_v45 = vsel %vm291_vm0, 1.0, %v410_v40  ;;  %vm290_vm7 = vcmp.eq.f32.partialorder %v272_v44, %v337_v8 }
 0x11a   :  { %303 = vst [vmem:[#allocation5 + $0x18] sm:$0xff] %v341_v45  ;;  %v340_v46 = vsel %vm290_vm7, 1.0, %v410_v40 }
 0x11b   :  { %302 = vst [vmem:[#allocation5 + $0x10] sm:$0xff] %v340_v46 }
 0x11c   :  { %393 = shalt.err (!%p390_p9)
}
 0x11d   :  { %s394_s18 = scalar_lea.hbm %s609_s4, 512 }
 0x11e   :  { %p395_p10 = scmp.ne.s32.totalorder %s609_s4, %s394_s18  ;;  %p398_p11 = scmp.lt.u32.totalorder %s394_s18, %s609_s4 }
 0x120   :  { %p400_p12 = pnand %p398_p11, %p395_p10 }
 0x122   :  { %403 = shalt.err (!%p400_p12)
}
 0x123   :  { %s412_s23 = smov 128   ;;  %s413_s0 = smov 8  }
 0x124   :  { %315 = dma.vmem_to_hbm [thread:$0]  %s310_s15, 512, %s609_s4, [#allocation3], %s412_s23, %s412_s23, %s413_s0  }
 0x125   :  { %406 = dma.done.wait [#allocation3], 512  }
 0x126   :  { %407 = vsyncadd [#allocation3], 4294966784 }
 0x127   :  { %319 = vsyncpa [#allocation3], 1 }
 0x128   :  { %320 = vsyncpa [#allocation4], 1 }

</bundles_post_ra>
